<compile_context>
chip_gen: v7x
topology: tpu7x:2x2x1
jax: 0.10.0
libtpu: 0.0.40
codegen_flags: <defaults>
</compile_context>

<pallas_src>
import functools

import jax
import jax.numpy as jnp
from jax.experimental import pallas as pl
from jax.experimental.pallas import tpu as pltpu


_LANE = 128     # vreg lane width
_MXU_M = 256    # MXU M-dim on v6e/v7x; also a multiple of v5e's 128


def _round_up(x, m):
    return ((x + m - 1) // m) * m


def _cdiv(a, b):
    return -(-a // b)


# ----------------------------------------------------------------------------
# Dropout mask: deterministic counter-hash (single-multiply mix finalizer).
# Shared between the kernel and the host-side reference so the test is exact.
# ----------------------------------------------------------------------------
def _keep_bits(shape, row_offset, seed_u32):
    """uint32 hash bits per (global_row, col, seed) element."""
    rows = (jax.lax.broadcasted_iota(jnp.int32, shape, 0) + row_offset).astype(jnp.uint32)
    cols = jax.lax.broadcasted_iota(jnp.int32, shape, 1).astype(jnp.uint32)
    h = rows * jnp.uint32(0x9E3779B1) + cols * jnp.uint32(0x85EBCA77) + seed_u32
    h = h ^ (h >> jnp.uint32(15))
    h = h * jnp.uint32(0x2C1B3C6D)
    h = h ^ (h >> jnp.uint32(17))
    return h


def _dropout_threshold(p):
    """keep iff bits >= threshold  <=>  keep with probability (1 - p)."""
    return jnp.uint32(min(int(round(p * 2.0 ** 32)), 2 ** 32 - 1))


# ----------------------------------------------------------------------------
# Kernel: one (tile_n, D_in_p) bf16 row tile -> (tile_n, D_out_p) output tile.
# ----------------------------------------------------------------------------
def _fc_block_kernel(seed_ref, x_ref, w1t_ref, b1_ref, w2t_ref, b2_ref, o_ref,
                     *, p, tile_n):
    # fc1 on the MXU: bf16 x bf16 -> f32 accumulate; ReLU / bias on the VPU.
    h = jnp.dot(x_ref[...], w1t_ref[...], preferred_element_type=jnp.float32)
    h = jnp.maximum(h + b1_ref[...], 0.0)                    # (TN, D_in_p) f32

    # Inverted dropout: integer-domain threshold on cheap hash bits.
    # The 1/(1-p) rescale is folded into W2^T on the host.
    if p > 0.0:
        row_off = pl.program_id(0) * tile_n
        bits = _keep_bits(h.shape, row_off, seed_ref[0].astype(jnp.uint32))
        h = jnp.where(bits >= _dropout_threshold(p), h, 0.0)

    # fc2 on the MXU (bf16 in, f32 acc); single lane-dense store.
    out = jnp.dot(h.astype(w2t_ref.dtype), w2t_ref[...],
                  preferred_element_type=jnp.float32)
    o_ref[...] = (out + b2_ref[...]).astype(o_ref.dtype)


# ----------------------------------------------------------------------------
# Tiling / VMEM helpers
# ----------------------------------------------------------------------------
def _vmem_capacity_bytes():
    try:
        info = pltpu.get_tpu_info()
        cap = getattr(info, "vmem_capacity_bytes", None)
        if cap:
            return int(cap)
    except Exception:
        pass
    return 64 * 1024 * 1024   # conservative: v7x per-TensorCore VMEM


def _resident_bytes(d_in_p, d_out_p):
    # bf16 W1^T + W2^T (single-buffered) + f32 biases.
    return 2 * (d_in_p * d_in_p + d_in_p * d_out_p) + 4 * (d_in_p + d_out_p)


def _pick_tile_n(n_rows, d_in_p, d_out_p, vmem_budget_bytes):
    """MXU-aligned row-tile size that fits the per-generation VMEM budget."""
    resident = _resident_bytes(d_in_p, d_out_p)
    # Per row: bf16 x tile (double-buffered) + f32 & bf16 hidden + mask
    #          + f32 output tile (double-buffered) + f32 matmul accumulator.
    per_row = (2 * 2 + 4 + 2 + 4) * d_in_p + (2 * 4 + 4) * d_out_p
    avail = max(vmem_budget_bytes - resident, 8 * per_row)
    cap = int(min(max(avail // per_row, 8), 4096))
    if n_rows <= cap:
        return _round_up(n_rows, 8)                       # single tile
    tile = (cap // _MXU_M) * _MXU_M if cap >= _MXU_M else (cap // 8) * 8
    tile = max(tile, 8)
    # Prefer an even grid so both v7x TensorCores get equal work.
    grid = _cdiv(n_rows, tile)
    if grid > 1 and grid % 2 == 1:
        align = _MXU_M if tile >= _MXU_M else 8
        tile = max(_round_up(_cdiv(n_rows, grid + 1), align), 8)
    return int(tile)


# ----------------------------------------------------------------------------
# Wrapper
# ----------------------------------------------------------------------------
def fully_connected_linear_block(x, w1, b1, w2, b2, *, seed=0, p=0.5,
                                 tile_n=None):
    """out = dropout(relu(x @ w1.T + b1), p) @ w2.T + b2  (PyTorch convention)."""
    n_rows, d_in = x.shape
    d_out, d_in2 = w2.shape
    assert w1.shape == (d_in, d_in) and d_in2 == d_in
    assert b1.shape == (d_in,) and b2.shape == (d_out,)
    assert 0.0 <= p < 1.0

    d_in_p = _round_up(d_in, _LANE)
    d_out_p = _round_up(d_out, _LANE)

    # Pre-transpose + zero-pad once on the host; weights resident in bf16.
    # Fold the 1/(1-p) dropout rescale into W2^T (amortized over all rows).
    w2_scale = 1.0 / (1.0 - p) if p > 0.0 else 1.0
    w1t = jnp.pad(jnp.asarray(w1, jnp.float32).T,
                  ((0, d_in_p - d_in), (0, d_in_p - d_in))).astype(jnp.bfloat16)
    w2t = jnp.pad(jnp.asarray(w2, jnp.float32).T * w2_scale,
                  ((0, d_in_p - d_in), (0, d_out_p - d_out))).astype(jnp.bfloat16)
    b1p = jnp.pad(jnp.asarray(b1, jnp.float32),
                  (0, d_in_p - d_in)).reshape(1, d_in_p)
    b2p = jnp.pad(jnp.asarray(b2, jnp.float32),
                  (0, d_out_p - d_out)).reshape(1, d_out_p)
    seed_arr = jnp.asarray([seed], dtype=jnp.int32)

    # Per-generation VMEM budget (physical-capacity aware), not a 12 MiB const.
    vmem_cap = _vmem_capacity_bytes()
    vmem_budget = int(0.60 * vmem_cap)
    vmem_limit = int(0.75 * vmem_cap)
    # TODO(synk): K-tiled weight path once resident weights exceed the budget.
    assert _resident_bytes(d_in_p, d_out_p) < vmem_budget, \
        "input_dim too large for resident weights on this generation"

    if tile_n is None:
        tile_n = _pick_tile_n(n_rows, d_in_p, d_out_p, vmem_budget)
    tile_n = int(tile_n)
    n_pad = _round_up(max(n_rows, tile_n), tile_n)

    # Pad rows to the tile size and lanes to 128; feed bf16 to the MXU.
    x_p = jnp.pad(jnp.asarray(x).astype(jnp.bfloat16),
                  ((0, n_pad - n_rows), (0, d_in_p - d_in)))

    out_dtype = x.dtype
    grid = (n_pad // tile_n,)
    kernel = functools.partial(_fc_block_kernel, p=float(p), tile_n=tile_n)

    def _call(single_buffer_weights):
        # Resident (constant index_map) operands don't need double-buffering.
        kw = ({"pipeline_mode": pl.Buffered(1)} if single_buffer_weights else {})
        out = pl.pallas_call(
            kernel,
            out_shape=jax.ShapeDtypeStruct((n_pad, d_out_p), out_dtype),
            grid=grid,
            in_specs=[
                pl.BlockSpec(memory_space=pltpu.MemorySpace.SMEM),        # seed
                pl.BlockSpec((tile_n, d_in_p), lambda i: (i, 0)),         # x tile
                pl.BlockSpec((d_in_p, d_in_p), lambda i: (0, 0), **kw),   # W1^T
                pl.BlockSpec((1, d_in_p), lambda i: (0, 0), **kw),        # b1
                pl.BlockSpec((d_in_p, d_out_p), lambda i: (0, 0), **kw),  # W2^T
                pl.BlockSpec((1, d_out_p), lambda i: (0, 0), **kw),       # b2
            ],
            out_specs=pl.BlockSpec((tile_n, d_out_p), lambda i: (i, 0)),
            compiler_params=pltpu.CompilerParams(
                dimension_semantics=("parallel",),
                vmem_limit_bytes=vmem_limit,
            ),
        )(seed_arr, x_p, w1t, b1p, w2t, b2p)
        return jax.block_until_ready(out)

    try:
        out = _call(True)
    except Exception:
        # Older Pallas without pipeline_mode / Buffered(1): double-buffer weights.
        out = _call(False)

    return out[:n_rows, :d_out]


# ----------------------------------------------------------------------------
# Demo / self-check
# ----------------------------------------------------------------------------
if __name__ == "__main__":
    # Small shapes consistent with the module: batch=16, input_dim=32, output_dim=16.
    N, D_IN, D_OUT = 16, 32, 16
    P = 0.5            # PyTorch default for this block
    SEED = 1234

    key = jax.random.PRNGKey(0)
    kx, kw1, kb1, kw2, kb2 = jax.random.split(key, 5)
    x = jax.random.normal(kx, (N, D_IN), dtype=jnp.float32)
    w1 = jax.random.normal(kw1, (D_IN, D_IN), dtype=jnp.float32) / jnp.sqrt(D_IN)
    b1 = 0.1 * jax.random.normal(kb1, (D_IN,), dtype=jnp.float32)
    w2 = jax.random.normal(kw2, (D_OUT, D_IN), dtype=jnp.float32) / jnp.sqrt(D_IN)
    b2 = 0.1 * jax.random.normal(kb2, (D_OUT,), dtype=jnp.float32)

    out = fully_connected_linear_block(x, w1, b1, w2, b2, seed=SEED, p=P)
    out = jax.block_until_ready(out)
    assert out.shape == (N, D_OUT) and out.dtype == x.dtype

    # Reference #1: mirrors the kernel's bf16-MXU numerics and the SAME mask.
    bits = _keep_bits((N, D_IN), 0, jnp.uint32(SEED))
    keep = bits >= _dropout_threshold(P)
    x_bf = x.astype(jnp.bfloat16)
    w1t_bf = w1.T.astype(jnp.bfloat16)
    w2t_bf = (w2.T / (1.0 - P)).astype(jnp.bfloat16)
    h_ref = jnp.maximum(
        jnp.dot(x_bf, w1t_bf, preferred_element_type=jnp.float32) + b1, 0.0)
    h_ref = jnp.where(keep, h_ref, 0.0)
    ref = jnp.dot(h_ref.astype(jnp.bfloat16), w2t_bf,
                  preferred_element_type=jnp.float32) + b2
    assert bool(jnp.allclose(out, ref, atol=5e-2, rtol=5e-2)), \
        f"max abs diff vs bf16 reference {float(jnp.max(jnp.abs(out - ref)))}"

    # Reference #2: exact f32 PyTorch-semantics math (loose bound for the
    # bf16-MXU approximation).
    h32 = jnp.maximum(x @ w1.T + b1, 0.0)
    h32 = jnp.where(keep, h32 / (1.0 - P), 0.0)
    ref32 = h32 @ w2.T + b2
    assert bool(jnp.allclose(out, ref32, atol=0.25, rtol=0.1)), \
        f"max abs diff vs f32 reference {float(jnp.max(jnp.abs(out - ref32)))}"

    drop_frac = float(jnp.mean(~keep))
    assert 0.25 < drop_frac < 0.75, f"unexpected dropout fraction {drop_frac}"

    print("KERNEL_OK")
</pallas_src>

<mosaic_0001>
module attributes {stable_mosaic.version = 11 : i64} {
  func.func @_fc_block_kernel(%arg0: i32, %arg1: memref<1xi32, #tpu.memory_space<smem>>, %arg2: memref<16x128xbf16, #tpu.memory_space<vmem>>, %arg3: memref<128x128xbf16, #tpu.memory_space<vmem>>, %arg4: memref<1x128xf32, #tpu.memory_space<vmem>>, %arg5: memref<128x128xbf16, #tpu.memory_space<vmem>>, %arg6: memref<1x128xf32, #tpu.memory_space<vmem>>, %arg7: memref<16x128xf32, #tpu.memory_space<vmem>>) attributes {dimension_semantics = [#tpu.dimension_semantics<parallel>], iteration_bounds = array<i64: 1>, scalar_prefetch = 0 : i64, scratch_operands = 0 : i64, tpu.core_type = #tpu.core_type<tc>, window_params = [{transform_indices = @transform_0, window_bounds = array<i64: 1>}, {transform_indices = @transform_1, window_bounds = array<i64: 16, 128>}, {pipeline_mode = #tpu.pipeline_mode<synchronous>, transform_indices = @transform_2, window_bounds = array<i64: 128, 128>}, {pipeline_mode = #tpu.pipeline_mode<synchronous>, transform_indices = @transform_3, window_bounds = array<i64: 1, 128>}, {pipeline_mode = #tpu.pipeline_mode<synchronous>, transform_indices = @transform_4, window_bounds = array<i64: 128, 128>}, {pipeline_mode = #tpu.pipeline_mode<synchronous>, transform_indices = @transform_5, window_bounds = array<i64: 1, 128>}, {transform_indices = @transform_6, window_bounds = array<i64: 16, 128>}]} {
    %c0 = arith.constant 0 : index
    %c0_0 = arith.constant 0 : index
    %0 = vector.load %arg2[%c0, %c0_0] : memref<16x128xbf16, #tpu.memory_space<vmem>>, vector<16x128xbf16>
    %c0_1 = arith.constant 0 : index
    %c0_2 = arith.constant 0 : index
    %1 = vector.load %arg3[%c0_1, %c0_2] : memref<128x128xbf16, #tpu.memory_space<vmem>>, vector<128x128xbf16>
    %cst = arith.constant dense<0.000000e+00> : vector<16x128xf32>
    %2 = tpu.matmul %0, %1, %cst {dimension_numbers = #tpu.dot_dimension_numbers<[1], [0], [0], [1], [0, 0, 1, 1], [], []>} : vector<16x128xbf16>, vector<128x128xbf16>, vector<16x128xf32> -> vector<16x128xf32>
    %c0_3 = arith.constant 0 : index
    %c0_4 = arith.constant 0 : index
    %3 = vector.load %arg4[%c0_3, %c0_4] : memref<1x128xf32, #tpu.memory_space<vmem>>, vector<1x128xf32>
    %4 = vector.broadcast %3 : vector<1x128xf32> to vector<16x128xf32>
    %5 = arith.addf %2, %4 : vector<16x128xf32>
    %cst_5 = arith.constant 0.000000e+00 : f32
    %6 = vector.broadcast %cst_5 : f32 to vector<16x128xf32>
    %7 = arith.maximumf %5, %6 : vector<16x128xf32>
    %c16_i32 = arith.constant 16 : i32
    %8 = arith.muli %arg0, %c16_i32 : i32
    %c0_6 = arith.constant 0 : index
    %9 = memref.load %arg1[%c0_6] : memref<1xi32, #tpu.memory_space<smem>>
    %10 = tpu.iota {dimensions = array<i32: 0>} : vector<16x128xi32>
    %11 = vector.broadcast %8 : i32 to vector<16x128xi32>
    %12 = arith.addi %10, %11 : vector<16x128xi32>
    %13 = tpu.iota {dimensions = array<i32: 1>} : vector<16x128xi32>
    %c-1640531535_i32 = arith.constant -1640531535 : i32
    %14 = vector.broadcast %c-1640531535_i32 : i32 to vector<16x128xi32>
    %15 = arith.muli %12, %14 : vector<16x128xi32>
    %c-2048144777_i32 = arith.constant -2048144777 : i32
    %16 = vector.broadcast %c-2048144777_i32 : i32 to vector<16x128xi32>
    %17 = arith.muli %13, %16 : vector<16x128xi32>
    %18 = arith.addi %15, %17 : vector<16x128xi32>
    %19 = vector.broadcast %9 : i32 to vector<16x128xi32>
    %20 = arith.addi %18, %19 : vector<16x128xi32>
    %c15_i32 = arith.constant 15 : i32
    %21 = vector.broadcast %c15_i32 : i32 to vector<16x128xi32>
    %22 = arith.shrui %20, %21 : vector<16x128xi32>
    %23 = arith.xori %20, %22 : vector<16x128xi32>
    %c739982445_i32 = arith.constant 739982445 : i32
    %24 = vector.broadcast %c739982445_i32 : i32 to vector<16x128xi32>
    %25 = arith.muli %23, %24 : vector<16x128xi32>
    %c17_i32 = arith.constant 17 : i32
    %26 = vector.broadcast %c17_i32 : i32 to vector<16x128xi32>
    %27 = arith.shrui %25, %26 : vector<16x128xi32>
    %28 = arith.xori %25, %27 : vector<16x128xi32>
    %c-2147483648_i32 = arith.constant -2147483648 : i32
    %29 = vector.broadcast %c-2147483648_i32 : i32 to vector<16x128xi32>
    %30 = arith.cmpi uge, %28, %29 : vector<16x128xi32>
    %cst_7 = arith.constant 0.000000e+00 : f32
    %31 = vector.broadcast %cst_7 : f32 to vector<16x128xf32>
    %32 = arith.select %30, %7, %31 : vector<16x128xi1>, vector<16x128xf32>
    %33 = arith.truncf %32 : vector<16x128xf32> to vector<16x128xbf16>
    %c0_8 = arith.constant 0 : index
    %c0_9 = arith.constant 0 : index
    %34 = vector.load %arg5[%c0_8, %c0_9] : memref<128x128xbf16, #tpu.memory_space<vmem>>, vector<128x128xbf16>
    %cst_10 = arith.constant dense<0.000000e+00> : vector<16x128xf32>
    %35 = tpu.matmul %33, %34, %cst_10 {dimension_numbers = #tpu.dot_dimension_numbers<[1], [0], [0], [1], [0, 0, 1, 1], [], []>} : vector<16x128xbf16>, vector<128x128xbf16>, vector<16x128xf32> -> vector<16x128xf32>
    %c0_11 = arith.constant 0 : index
    %c0_12 = arith.constant 0 : index
    %36 = vector.load %arg6[%c0_11, %c0_12] : memref<1x128xf32, #tpu.memory_space<vmem>>, vector<1x128xf32>
    %37 = vector.broadcast %36 : vector<1x128xf32> to vector<16x128xf32>
    %38 = arith.addf %35, %37 : vector<16x128xf32>
    %c0_13 = arith.constant 0 : index
    %c0_14 = arith.constant 0 : index
    %39 = vector.load %arg7[%c0_13, %c0_14] : memref<16x128xf32, #tpu.memory_space<vmem>>, vector<16x128xf32>
    tpu.vector_store %arg7[%c0_13, %c0_14], %38 {strides = array<i32>} : memref<16x128xf32, #tpu.memory_space<vmem>>, vector<16x128xf32>,
    return
  }
  func.func @transform_0(%arg0: i32) -> i32 {
    %c0_i32 = arith.constant 0 : i32
    %c0_i32_0 = arith.constant 0 : i32
    return %c0_i32 : i32
  }
  func.func @transform_1(%arg0: i32) -> (i32, i32) {
    %c0_i32 = arith.constant 0 : i32
    %c0_i32_0 = arith.constant 0 : i32
    return %arg0, %c0_i32 : i32, i32
  }
  func.func @transform_2(%arg0: i32) -> (i32, i32) {
    %c0_i32 = arith.constant 0 : i32
    %c0_i32_0 = arith.constant 0 : i32
    %c0_i32_1 = arith.constant 0 : i32
    return %c0_i32, %c0_i32_0 : i32, i32
  }
  func.func @transform_3(%arg0: i32) -> (i32, i32) {
    %c0_i32 = arith.constant 0 : i32
    %c0_i32_0 = arith.constant 0 : i32
    %c0_i32_1 = arith.constant 0 : i32
    return %c0_i32, %c0_i32_0 : i32, i32
  }
  func.func @transform_4(%arg0: i32) -> (i32, i32) {
    %c0_i32 = arith.constant 0 : i32
    %c0_i32_0 = arith.constant 0 : i32
    %c0_i32_1 = arith.constant 0 : i32
    return %c0_i32, %c0_i32_0 : i32, i32
  }
  func.func @transform_5(%arg0: i32) -> (i32, i32) {
    %c0_i32 = arith.constant 0 : i32
    %c0_i32_0 = arith.constant 0 : i32
    %c0_i32_1 = arith.constant 0 : i32
    return %c0_i32, %c0_i32_0 : i32, i32
  }
  func.func @transform_6(%arg0: i32) -> (i32, i32) {
    %c0_i32 = arith.constant 0 : i32
    %c0_i32_0 = arith.constant 0 : i32
    return %arg0, %c0_i32 : i32, i32
  }
}

module attributes {stable_mosaic.version = 11 : i64} {
  func.func @_fc_block_kernel(%arg0: i32, %arg1: memref<1xi32, #tpu.memory_space<smem>>, %arg2: memref<16x128xbf16, #tpu.memory_space<vmem>>, %arg3: memref<128x128xbf16, #tpu.memory_space<vmem>>, %arg4: memref<1x128xf32, #tpu.memory_space<vmem>>, %arg5: memref<128x128xbf16, #tpu.memory_space<vmem>>, %arg6: memref<1x128xf32, #tpu.memory_space<vmem>>, %arg7: memref<16x128xf32, #tpu.memory_space<vmem>>) attributes {dimension_semantics = [#tpu.dimension_semantics<parallel>], iteration_bounds = array<i64: 1>, scalar_prefetch = 0 : i64, scratch_operands = 0 : i64, tpu.core_type = #tpu.core_type<tc>, window_params = [{transform_indices = @transform_0, window_bounds = array<i64: 1>}, {transform_indices = @transform_1, window_bounds = array<i64: 16, 128>}, {pipeline_mode = #tpu.pipeline_mode<synchronous>, transform_indices = @transform_2, window_bounds = array<i64: 128, 128>}, {pipeline_mode = #tpu.pipeline_mode<synchronous>, transform_indices = @transform_3, window_bounds = array<i64: 1, 128>}, {pipeline_mode = #tpu.pipeline_mode<synchronous>, transform_indices = @transform_4, window_bounds = array<i64: 128, 128>}, {pipeline_mode = #tpu.pipeline_mode<synchronous>, transform_indices = @transform_5, window_bounds = array<i64: 1, 128>}, {transform_indices = @transform_6, window_bounds = array<i64: 16, 128>}]} {
    %c0 = arith.constant 0 : index
    %c0_0 = arith.constant 0 : index
    %0 = vector.load %arg2[%c0, %c0_0] : memref<16x128xbf16, #tpu.memory_space<vmem>>, vector<16x128xbf16>
    %c0_1 = arith.constant 0 : index
    %c0_2 = arith.constant 0 : index
    %1 = vector.load %arg3[%c0_1, %c0_2] : memref<128x128xbf16, #tpu.memory_space<vmem>>, vector<128x128xbf16>
    %cst = arith.constant dense<0.000000e+00> : vector<16x128xf32>
    %2 = tpu.matmul %0, %1, %cst {dimension_numbers = #tpu.dot_dimension_numbers<[1], [0], [0], [1], [0, 0, 1, 1], [], []>} : vector<16x128xbf16>, vector<128x128xbf16>, vector<16x128xf32> -> vector<16x128xf32>
    %c0_3 = arith.constant 0 : index
    %c0_4 = arith.constant 0 : index
    %3 = vector.load %arg4[%c0_3, %c0_4] : memref<1x128xf32, #tpu.memory_space<vmem>>, vector<1x128xf32>
    %4 = vector.broadcast %3 : vector<1x128xf32> to vector<16x128xf32>
    %5 = arith.addf %2, %4 : vector<16x128xf32>
    %cst_5 = arith.constant 0.000000e+00 : f32
    %6 = vector.broadcast %cst_5 : f32 to vector<16x128xf32>
    %7 = arith.maximumf %5, %6 : vector<16x128xf32>
    %c16_i32 = arith.constant 16 : i32
    %8 = arith.muli %arg0, %c16_i32 : i32
    %c0_6 = arith.constant 0 : index
    %9 = memref.load %arg1[%c0_6] : memref<1xi32, #tpu.memory_space<smem>>
    %10 = tpu.iota {dimensions = array<i32: 0>} : vector<16x128xi32>
    %11 = vector.broadcast %8 : i32 to vector<16x128xi32>
    %12 = arith.addi %10, %11 : vector<16x128xi32>
    %13 = tpu.iota {dimensions = array<i32: 1>} : vector<16x128xi32>
    %c-1640531535_i32 = arith.constant -1640531535 : i32
    %14 = vector.broadcast %c-1640531535_i32 : i32 to vector<16x128xi32>
    %15 = arith.muli %12, %14 : vector<16x128xi32>
    %c-2048144777_i32 = arith.constant -2048144777 : i32
    %16 = vector.broadcast %c-2048144777_i32 : i32 to vector<16x128xi32>
    %17 = arith.muli %13, %16 : vector<16x128xi32>
    %18 = arith.addi %15, %17 : vector<16x128xi32>
    %19 = vector.broadcast %9 : i32 to vector<16x128xi32>
    %20 = arith.addi %18, %19 : vector<16x128xi32>
    %c15_i32 = arith.constant 15 : i32
    %21 = vector.broadcast %c15_i32 : i32 to vector<16x128xi32>
    %22 = arith.shrui %20, %21 : vector<16x128xi32>
    %23 = arith.xori %20, %22 : vector<16x128xi32>
    %c739982445_i32 = arith.constant 739982445 : i32
    %24 = vector.broadcast %c739982445_i32 : i32 to vector<16x128xi32>
    %25 = arith.muli %23, %24 : vector<16x128xi32>
    %c17_i32 = arith.constant 17 : i32
    %26 = vector.broadcast %c17_i32 : i32 to vector<16x128xi32>
    %27 = arith.shrui %25, %26 : vector<16x128xi32>
    %28 = arith.xori %25, %27 : vector<16x128xi32>
    %c-2147483648_i32 = arith.constant -2147483648 : i32
    %29 = vector.broadcast %c-2147483648_i32 : i32 to vector<16x128xi32>
    %30 = arith.cmpi uge, %28, %29 : vector<16x128xi32>
    %cst_7 = arith.constant 0.000000e+00 : f32
    %31 = vector.broadcast %cst_7 : f32 to vector<16x128xf32>
    %32 = arith.select %30, %7, %31 : vector<16x128xi1>, vector<16x128xf32>
    %33 = arith.truncf %32 : vector<16x128xf32> to vector<16x128xbf16>
    %c0_8 = arith.constant 0 : index
    %c0_9 = arith.constant 0 : index
    %34 = vector.load %arg5[%c0_8, %c0_9] : memref<128x128xbf16, #tpu.memory_space<vmem>>, vector<128x128xbf16>
    %cst_10 = arith.constant dense<0.000000e+00> : vector<16x128xf32>
    %35 = tpu.matmul %33, %34, %cst_10 {dimension_numbers = #tpu.dot_dimension_numbers<[1], [0], [0], [1], [0, 0, 1, 1], [], []>} : vector<16x128xbf16>, vector<128x128xbf16>, vector<16x128xf32> -> vector<16x128xf32>
    %c0_11 = arith.constant 0 : index
    %c0_12 = arith.constant 0 : index
    %36 = vector.load %arg6[%c0_11, %c0_12] : memref<1x128xf32, #tpu.memory_space<vmem>>, vector<1x128xf32>
    %37 = vector.broadcast %36 : vector<1x128xf32> to vector<16x128xf32>
    %38 = arith.addf %35, %37 : vector<16x128xf32>
    %c0_13 = arith.constant 0 : index
    %c0_14 = arith.constant 0 : index
    %39 = vector.load %arg7[%c0_13, %c0_14] : memref<16x128xf32, #tpu.memory_space<vmem>>, vector<16x128xf32>
    tpu.vector_store %arg7[%c0_13, %c0_14], %38 {strides = array<i32>} : memref<16x128xf32, #tpu.memory_space<vmem>>, vector<16x128xf32>,
    return
  }
  func.func @transform_0(%arg0: i32) -> i32 {
    %c0_i32 = arith.constant 0 : i32
    %c0_i32_0 = arith.constant 0 : i32
    return %c0_i32 : i32
  }
  func.func @transform_1(%arg0: i32) -> (i32, i32) {
    %c0_i32 = arith.constant 0 : i32
    %c0_i32_0 = arith.constant 0 : i32
    return %arg0, %c0_i32 : i32, i32
  }
  func.func @transform_2(%arg0: i32) -> (i32, i32) {
    %c0_i32 = arith.constant 0 : i32
    %c0_i32_0 = arith.constant 0 : i32
    %c0_i32_1 = arith.constant 0 : i32
    return %c0_i32, %c0_i32_0 : i32, i32
  }
  func.func @transform_3(%arg0: i32) -> (i32, i32) {
    %c0_i32 = arith.constant 0 : i32
    %c0_i32_0 = arith.constant 0 : i32
    %c0_i32_1 = arith.constant 0 : i32
    return %c0_i32, %c0_i32_0 : i32, i32
  }
  func.func @transform_4(%arg0: i32) -> (i32, i32) {
    %c0_i32 = arith.constant 0 : i32
    %c0_i32_0 = arith.constant 0 : i32
    %c0_i32_1 = arith.constant 0 : i32
    return %c0_i32, %c0_i32_0 : i32, i32
  }
  func.func @transform_5(%arg0: i32) -> (i32, i32) {
    %c0_i32 = arith.constant 0 : i32
    %c0_i32_0 = arith.constant 0 : i32
    %c0_i32_1 = arith.constant 0 : i32
    return %c0_i32, %c0_i32_0 : i32, i32
  }
  func.func @transform_6(%arg0: i32) -> (i32, i32) {
    %c0_i32 = arith.constant 0 : i32
    %c0_i32_0 = arith.constant 0 : i32
    return %arg0, %c0_i32 : i32, i32
  }
}

</mosaic_0001>

<bundles_post_ra>
// kernel: tpu_custom_call.1
= control target key start
LH: loop header
LB: loop body
LE: loop exit
PB: predicated region body
PF: predicated region fallthrough
CT: control target
= control target key end

     0   :  { %12 = vsyncpa [#allocation4], 0  ;;  %s673_s0 = inlined_call_operand.<no memory space> [shape: s32[1], index: 0, kind: input, shape index: {}]   ;;  %s674_s1 = inlined_call_operand.hbm [shape: bf16[16,128], index: 1, kind: input, shape index: {}]   ;;  %s675_s2 = inlined_call_operand.hbm [shape: bf16[128,128], index: 2, kind: input, shape index: {}]   ;;  %s676_s3 = inlined_call_operand.vmem [shape: f32[1,128], index: 3, kind: input, shape index: {}]   ;;  %s677_s4 = inlined_call_operand.hbm [shape: bf16[128,128], index: 4, kind: input, shape index: {}]   ;;  %s678_s5 = inlined_call_operand.vmem [shape: f32[1,128], index: 5, kind: input, shape index: {}]   ;;  %s679_s6 = inlined_call_operand.hbm [shape: f32[16,128], index: 6, kind: output, shape index: {}]  }
   0x1   :  { %13 = vsyncpa [#allocation7], 0 }
   0x2   :  { %14 = vsyncpa [#allocation5], 0  ;;  %s555_s21 = smov [#allocation6]   ;;  %s556_s23 = smov [#allocation3]  }
   0x3   :  { %s34_s22 = sshll.u32 %s555_s21, 4  ;;  %s22_s24 = sshll.u32 %s556_s23, 4  ;;  %s35_s22 = int_to_ptr.vmem [resolvable:$true] %s34_s22  ;;  %s600_s24 = int_to_ptr.vmem [resolvable:$true] %s22_s24 }
   0x4   :  { %s461_s27 = scalar_lea.hbm %s675_s2, 1024 }
   0x5   :  { %p462_p0 = scmp.ne.s32.totalorder %s675_s2, %s461_s27  ;;  %p465_p1 = scmp.lt.u32.totalorder %s461_s27, %s675_s2 }
   0x7   :  { %p467_p2 = pnand %p465_p1, %p462_p0 }
   0x9   :  { %470 = shalt.err (!%p467_p2)
}
   0xa   :  { %s471_s8 = scalar_lea.vmem %s35_s22, 1024  ;;  %p476_p4 = scmp.lt.s32.totalorder %s35_s22, %s35_s22 }
   0xb   :  { %p472_p3 = scmp.ne.s32.totalorder %s35_s22, %s471_s8  ;;  %p477_p5 = scmp.lt.s32.totalorder %s471_s8, %s471_s8 }
   0xd   :  { %p478_p6 = por %p477_p5, %p476_p4 }
   0xf   :  { %p479_p7 = pnand %p478_p6, %p472_p3 }
  0x11   :  { %482 = shalt.err (!%p479_p7)
}
  0x12   :  { %s557_s9 = smov 64   ;;  %s558_s10 = smov 4  }
  0x13   :  { %40 = dma.hbm_to_vmem [thread:$0]  %s675_s2, 1024, %s35_s22, [#allocation7], %s557_s9, %s557_s9, %s558_s10  }
  0x14   :  { %s483_s15 = scalar_lea.hbm %s674_s1, 128 }
  0x15   :  { %p484_p8 = scmp.ne.s32.totalorder %s674_s1, %s483_s15  ;;  %p487_p9 = scmp.lt.u32.totalorder %s483_s15, %s674_s1 }
  0x17   :  { %p489_p10 = pnand %p487_p9, %p484_p8 }
  0x19   :  { %492 = shalt.err (!%p489_p10)
}
  0x1a   :  { %s493_s20 = scalar_lea.vmem %s600_s24, 128  ;;  %p498_p12 = scmp.lt.s32.totalorder %s600_s24, %s600_s24 }
  0x1b   :  { %p494_p11 = scmp.ne.s32.totalorder %s600_s24, %s493_s20  ;;  %p499_p13 = scmp.lt.s32.totalorder %s493_s20, %s493_s20 }
  0x1d   :  { %p500_p0 = por %p499_p13, %p498_p12 }
  0x1f   :  { %p501_p1 = pnand %p500_p0, %p494_p11 }
  0x21   :  { %504 = shalt.err (!%p501_p1)
}
  0x22   :  { %28 = dma.hbm_to_vmem [thread:$0]  %s674_s1, 128, %s600_s24, [#allocation4], %s557_s9, %s557_s9, %s558_s10  }
  0x23   :  { %s559_s22 = smov [#allocation8]   ;;  %s505_s27 = scalar_lea.hbm %s677_s4, 1024 }
  0x24   :  { %s48_s23 = sshll.u32 %s559_s22, 4  ;;  %p506_p2 = scmp.ne.s32.totalorder %s677_s4, %s505_s27  ;;  %s49_s23 = int_to_ptr.vmem [resolvable:$true] %s48_s23 }
  0x25   :  { %p509_p3 = scmp.lt.u32.totalorder %s505_s27, %s677_s4 }
  0x27   :  { %p511_p4 = pnand %p509_p3, %p506_p2 }
  0x29   :  { %514 = shalt.err (!%p511_p4)
}
  0x2a   :  { %s515_s8 = scalar_lea.vmem %s49_s23, 1024  ;;  %p520_p6 = scmp.lt.s32.totalorder %s49_s23, %s49_s23 }
  0x2b   :  { %p516_p5 = scmp.ne.s32.totalorder %s49_s23, %s515_s8  ;;  %p521_p7 = scmp.lt.s32.totalorder %s515_s8, %s515_s8 }
  0x2d   :  { %p522_p8 = por %p521_p7, %p520_p6 }
  0x2f   :  { %p523_p9 = pnand %p522_p8, %p516_p5 }
  0x31   :  { %526 = shalt.err (!%p523_p9)
}
  0x32   :  { %54 = dma.hbm_to_vmem [thread:$0]  %s677_s4, 1024, %s49_s23, [#allocation7], %s557_s9, %s557_s9, %s558_s10  }
  0x33   :  { %549 = dma.done.wait [#allocation4], 128  }
  0x34   :  { %550 = vsyncadd [#allocation4], 4294967168 }
  0x35   :  { %551 = dma.done.wait [#allocation7], 2048  }
  0x36   :  { %552 = vsyncadd [#allocation7], 4294965248  ;;  %v560_v0 = vmov 0.0   ;;  %vm561_vm0 = vmmov 0   ;;  %v444_v1 = vld [vmem:[#allocation6] sm:$0xff]   ;;  %v445_v2 = vld [vmem:[#allocation6 + $0x8] sm:$0xff]   ;;  %v191_v18 = vlaneseq  ;;  %v204_v27 = vstv %s673_s0 }
  0x37   :  { %394 = vmatprep.subr.bf16.mxu0 %v560_v0  ;;  %410 = vmatprep.mubr.msk.bf16.mxu0 %vm561_vm0, %v560_v0  ;;  %v446_v3 = vld [vmem:[#allocation6 + $0x10] sm:$0xff]   ;;  %v453_v4 = vld [vmem:[#allocation8] sm:$0xff]   ;;  %v447_v5 = vld [vmem:[#allocation6 + $0x18] sm:$0xff]  }
  0x38   :  { %414 = vmatprep.subr.bf16.mxu1 %v560_v0  ;;  %430 = vmatprep.mubr.msk.bf16.mxu1 %vm561_vm0, %v560_v0  ;;  %v454_v6 = vld [vmem:[#allocation8 + $0x8] sm:$0xff]   ;;  %v448_v7 = vld [vmem:[#allocation6 + $0x20] sm:$0xff]   ;;  %v455_v8 = vld [vmem:[#allocation8 + $0x10] sm:$0xff]   ;;  %v192_v19 = vshrl.u32 %v191_v18, 7  ;;  %v198_v21 = vand.u32 127, %v191_v18 }
  0x39   :  { %395 = vmatpush3.bf16.msra.mxu0 %v444_v1  ;;  %415 = vmatpush3.bf16.msra.mxu1 %v453_v4  ;;  %v449_v9 = vld [vmem:[#allocation6 + $0x28] sm:$0xff]   ;;  %v456_v10 = vld [vmem:[#allocation8 + $0x18] sm:$0xff]   ;;  %v450_v11 = vld [vmem:[#allocation6 + $0x30] sm:$0xff]  }
  0x3a   :  { %396 = vmatprep.subr.bf16.mxu0 %v560_v0  ;;  %416 = vmatprep.subr.bf16.mxu1 %v560_v0  ;;  %v457_v12 = vld [vmem:[#allocation8 + $0x20] sm:$0xff]   ;;  %v451_v13 = vld [vmem:[#allocation6 + $0x38] sm:$0xff]   ;;  %v458_v14 = vld [vmem:[#allocation8 + $0x28] sm:$0xff]   ;;  %v193_v20 = vadd.s32 8, %v192_v19  ;;  %v199_v22 = vmul.u32 2654435761, %v192_v19 }
  0x3b   :  { %v452_v15 = vld [vmem:[#allocation3] sm:$0xff]   ;;  %v459_v16 = vld [vmem:[#allocation8 + $0x30] sm:$0xff]   ;;  %v201_v24 = vmul.u32 2246822519, %v198_v21 }
  0x3c   :  { %v460_v17 = vld [vmem:[#allocation8 + $0x38] sm:$0xff]   ;;  %v200_v23 = vmul.u32 2654435761, %v193_v20 }
  0x3d   :  { %397 = vmatpush3.bf16.msra.mxu0 %v445_v2  ;;  %417 = vmatpush3.bf16.msra.mxu1 %v454_v6  ;;  %v202_v25 = vadd.s32 %v201_v24, %v199_v22  ;;  %v354_v38 = vld [vmem:[%s676_s3] ss:$0 sm:$0xff]  ;;  %s562_s3 = smov [#allocation9]  }
  0x3e   :  { %398 = vmatprep.subr.bf16.mxu0 %v560_v0  ;;  %418 = vmatprep.subr.bf16.mxu1 %v560_v0  ;;  %v203_v26 = vadd.s32 %v201_v24, %v200_v23  ;;  %v364_v50 = vld [vmem:[%s678_s5] ss:$0 sm:$0xff]  ;;  %s341_s13 = sshll.u32 %s562_s3, 4  ;;  %s342_s13 = int_to_ptr.vmem [resolvable:$true] %s341_s13 }
  0x3f   :  { %v205_v28 = vadd.s32 %v204_v27, %v202_v25  ;;  %s527_s14 = scalar_lea.vmem %s342_s13, 256  ;;  %p532_p11 = scmp.lt.s32.totalorder %s342_s13, %s342_s13 }
  0x40   :  { %v206_v29 = vadd.s32 %v204_v27, %v203_v26  ;;  %p528_p10 = scmp.ne.s32.totalorder %s342_s13, %s527_s14  ;;  %p533_p12 = scmp.lt.s32.totalorder %s527_s14, %s527_s14 }
  0x41   :  { %399 = vmatpush3.bf16.msra.mxu0 %v446_v3  ;;  %419 = vmatpush3.bf16.msra.mxu1 %v455_v8  ;;  %v207_v30 = vshrl.u32 %v205_v28, 15 }
  0x42   :  { %400 = vmatprep.subr.bf16.mxu0 %v560_v0  ;;  %420 = vmatprep.subr.bf16.mxu1 %v560_v0  ;;  %v208_v31 = vshrl.u32 %v206_v29, 15  ;;  %p534_p13 = por %p533_p12, %p532_p11 }
  0x43   :  { %v209_v32 = vxor.u32 %v207_v30, %v205_v28 }
  0x44   :  { %v210_v33 = vxor.u32 %v208_v31, %v206_v29  ;;  %p535_p0 = pnand %p534_p13, %p528_p10 }
  0x45   :  { %401 = vmatpush3.bf16.msra.mxu0 %v447_v5  ;;  %421 = vmatpush3.bf16.msra.mxu1 %v456_v10  ;;  %v211_v34 = vmul.u32 739982445, %v209_v32 }
  0x46   :  { %402 = vmatprep.subr.bf16.mxu0 %v560_v0  ;;  %422 = vmatprep.subr.bf16.mxu1 %v560_v0  ;;  %v212_v35 = vmul.u32 739982445, %v210_v33 }
  0x47   :  { %v213_v36 = vshrl.u32 %v211_v34, 17 }
  0x48   :  { %v214_v37 = vshrl.u32 %v212_v35, 17 }
  0x49   :  { %403 = vmatpush3.bf16.msra.mxu0 %v448_v7  ;;  %423 = vmatpush3.bf16.msra.mxu1 %v457_v12  ;;  %v215_v39 = vxor.u32 %v213_v36, %v211_v34 }
  0x4a   :  { %404 = vmatprep.subr.bf16.mxu0 %v560_v0  ;;  %424 = vmatprep.subr.bf16.mxu1 %v560_v0  ;;  %v216_v40 = vxor.u32 %v214_v37, %v212_v35 }
  0x4b   :  { %vm217_vm1 = vcmp.ge.u32.totalorder %v215_v39, 2147483648 }
  0x4c   :  { %vm218_vm2 = vcmp.ge.u32.totalorder %v216_v40, 2147483648 }
  0x4d   :  { %405 = vmatpush3.bf16.msra.mxu0 %v449_v9  ;;  %425 = vmatpush3.bf16.msra.mxu1 %v458_v14  ;;  %vm373_vm3 = vmpackc.low %vm218_vm2, %vm217_vm1 }
  0x4e   :  { %406 = vmatprep.subr.bf16.mxu0 %v560_v0  ;;  %426 = vmatprep.subr.bf16.mxu1 %v560_v0 }
  0x51   :  { %407 = vmatpush3.bf16.msra.mxu0 %v450_v11  ;;  %427 = vmatpush3.bf16.msra.mxu1 %v459_v16 }
  0x52   :  { %408 = vmatprep.subr.bf16.mxu0 %v560_v0  ;;  %428 = vmatprep.subr.bf16.mxu1 %v560_v0 }
  0x55   :  { %409 = vmatpush3.bf16.msra.mxu0 %v451_v13  ;;  %429 = vmatpush3.bf16.msra.mxu1 %v460_v17 }
  0x58   :  { %411 = vmatmul.mubr.bf16.vlgmr.msra.gmra.mrb[0].mxu0 %v452_v15 }
 0x12b   :  { %v180_v41 = vpop.f32.mrb[0].mxu0 }
 0x12c   :  { %v181_v42 = vadd.f32 %v354_v38, %v180_v41  ;;  %v412_v43 = vpop.f32.mrb[1].mxu0 }
 0x12d   :  { %v183_v44 = vpop.f32.mrb[2].mxu0 }
 0x12e   :  { %v184_v45 = vadd.f32 %v354_v38, %v183_v44  ;;  %v413_v46 = vpop.f32.mrb[3].mxu0  ;;  %v187_v47 = vmax.f32 %v181_v42, 0.0 }
 0x130   :  { %v188_v48 = vmax.f32 %v184_v45, 0.0 }
 0x132   :  { %v374_v49 = vpack.c.bf16 %v188_v48, %v187_v47 }
 0x134   :  { %431 = vmatmul.mubr.msk.bf16.vlgmr.msra.gmra.mrb[0].mxu1 %vm373_vm3, %v374_v49 }
 0x207   :  { %v327_v51 = vpop.f32.mrb[0].mxu1 }
 0x208   :  { %v328_v52 = vadd.f32 %v364_v50, %v327_v51  ;;  %v432_v53 = vpop.f32.mrb[1].mxu1 }
 0x209   :  { %v330_v54 = vpop.f32.mrb[2].mxu1 }
 0x20a   :  { %334 = vst [vmem:[#allocation9] sm:$0xff] %v328_v52  ;;  %v331_v55 = vadd.f32 %v364_v50, %v330_v54  ;;  %v433_v56 = vpop.f32.mrb[3].mxu1 }
 0x20c   :  { %335 = vst [vmem:[#allocation9 + $0x8] sm:$0xff] %v331_v55 }
 0x20d   :  { %538 = shalt.err (!%p535_p0)
}
 0x20e   :  { %s539_s16 = scalar_lea.hbm %s679_s6, 256 }
 0x20f   :  { %p540_p1 = scmp.ne.s32.totalorder %s679_s6, %s539_s16  ;;  %p543_p2 = scmp.lt.u32.totalorder %s539_s16, %s679_s6 }
 0x211   :  { %p545_p3 = pnand %p543_p2, %p540_p1 }
 0x213   :  { %548 = shalt.err (!%p545_p3)
}
 0x214   :  { %s563_s2 = smov 128   ;;  %s564_s21 = smov 8  }
 0x215   :  { %347 = dma.vmem_to_hbm [thread:$0]  %s342_s13, 256, %s679_s6, [#allocation5], %s563_s2, %s563_s2, %s564_s21  }
 0x216   :  { %553 = dma.done.wait [#allocation5], 256  }
 0x217   :  { %554 = vsyncadd [#allocation5], 4294967040 }
 0x218   :  { %351 = vsyncpa [#allocation4], 1 }
 0x219   :  { %352 = vsyncpa [#allocation7], 1 }
 0x21a   :  { %353 = vsyncpa [#allocation5], 1 }

// kernel: tpu_custom_call.1
= control target key start
LH: loop header
LB: loop body
LE: loop exit
PB: predicated region body
PF: predicated region fallthrough
CT: control target
= control target key end

     0   :  { %12 = vsyncpa [#allocation4], 0  ;;  %s673_s0 = inlined_call_operand.<no memory space> [shape: s32[1], index: 0, kind: input, shape index: {}]   ;;  %s674_s1 = inlined_call_operand.hbm [shape: bf16[16,128], index: 1, kind: input, shape index: {}]   ;;  %s675_s2 = inlined_call_operand.hbm [shape: bf16[128,128], index: 2, kind: input, shape index: {}]   ;;  %s676_s3 = inlined_call_operand.vmem [shape: f32[1,128], index: 3, kind: input, shape index: {}]   ;;  %s677_s4 = inlined_call_operand.hbm [shape: bf16[128,128], index: 4, kind: input, shape index: {}]   ;;  %s678_s5 = inlined_call_operand.vmem [shape: f32[1,128], index: 5, kind: input, shape index: {}]   ;;  %s679_s6 = inlined_call_operand.hbm [shape: f32[16,128], index: 6, kind: output, shape index: {}]  }
   0x1   :  { %13 = vsyncpa [#allocation7], 0 }
   0x2   :  { %14 = vsyncpa [#allocation5], 0  ;;  %s555_s21 = smov [#allocation6]   ;;  %s556_s23 = smov [#allocation3]  }
   0x3   :  { %s34_s22 = sshll.u32 %s555_s21, 4  ;;  %s22_s24 = sshll.u32 %s556_s23, 4  ;;  %s35_s22 = int_to_ptr.vmem [resolvable:$true] %s34_s22  ;;  %s600_s24 = int_to_ptr.vmem [resolvable:$true] %s22_s24 }
   0x4   :  { %s461_s27 = scalar_lea.hbm %s675_s2, 1024 }
   0x5   :  { %p462_p0 = scmp.ne.s32.totalorder %s675_s2, %s461_s27  ;;  %p465_p1 = scmp.lt.u32.totalorder %s461_s27, %s675_s2 }
   0x7   :  { %p467_p2 = pnand %p465_p1, %p462_p0 }
   0x9   :  { %470 = shalt.err (!%p467_p2)
}
   0xa   :  { %s471_s8 = scalar_lea.vmem %s35_s22, 1024  ;;  %p476_p4 = scmp.lt.s32.totalorder %s35_s22, %s35_s22 }
   0xb   :  { %p472_p3 = scmp.ne.s32.totalorder %s35_s22, %s471_s8  ;;  %p477_p5 = scmp.lt.s32.totalorder %s471_s8, %s471_s8 }
   0xd   :  { %p478_p6 = por %p477_p5, %p476_p4 }
   0xf   :  { %p479_p7 = pnand %p478_p6, %p472_p3 }
  0x11   :  { %482 = shalt.err (!%p479_p7)
}
  0x12   :  { %s557_s9 = smov 64   ;;  %s558_s10 = smov 4  }
  0x13   :  { %40 = dma.hbm_to_vmem [thread:$0]  %s675_s2, 1024, %s35_s22, [#allocation7], %s557_s9, %s557_s9, %s558_s10  }
  0x14   :  { %s483_s15 = scalar_lea.hbm %s674_s1, 128 }
  0x15   :  { %p484_p8 = scmp.ne.s32.totalorder %s674_s1, %s483_s15  ;;  %p487_p9 = scmp.lt.u32.totalorder %s483_s15, %s674_s1 }
  0x17   :  { %p489_p10 = pnand %p487_p9, %p484_p8 }
  0x19   :  { %492 = shalt.err (!%p489_p10)
}
  0x1a   :  { %s493_s20 = scalar_lea.vmem %s600_s24, 128  ;;  %p498_p12 = scmp.lt.s32.totalorder %s600_s24, %s600_s24 }
  0x1b   :  { %p494_p11 = scmp.ne.s32.totalorder %s600_s24, %s493_s20  ;;  %p499_p13 = scmp.lt.s32.totalorder %s493_s20, %s493_s20 }
  0x1d   :  { %p500_p0 = por %p499_p13, %p498_p12 }
  0x1f   :  { %p501_p1 = pnand %p500_p0, %p494_p11 }
  0x21   :  { %504 = shalt.err (!%p501_p1)
}
  0x22   :  { %28 = dma.hbm_to_vmem [thread:$0]  %s674_s1, 128, %s600_s24, [#allocation4], %s557_s9, %s557_s9, %s558_s10  }
  0x23   :  { %s559_s22 = smov [#allocation8]   ;;  %s505_s27 = scalar_lea.hbm %s677_s4, 1024 }
  0x24   :  { %s48_s23 = sshll.u32 %s559_s22, 4  ;;  %p506_p2 = scmp.ne.s32.totalorder %s677_s4, %s505_s27  ;;  %s49_s23 = int_to_ptr.vmem [resolvable:$true] %s48_s23 }
  0x25   :  { %p509_p3 = scmp.lt.u32.totalorder %s505_s27, %s677_s4 }
  0x27   :  { %p511_p4 = pnand %p509_p3, %p506_p2 }
  0x29   :  { %514 = shalt.err (!%p511_p4)
}
  0x2a   :  { %s515_s8 = scalar_lea.vmem %s49_s23, 1024  ;;  %p520_p6 = scmp.lt.s32.totalorder %s49_s23, %s49_s23 }
  0x2b   :  { %p516_p5 = scmp.ne.s32.totalorder %s49_s23, %s515_s8  ;;  %p521_p7 = scmp.lt.s32.totalorder %s515_s8, %s515_s8 }
  0x2d   :  { %p522_p8 = por %p521_p7, %p520_p6 }
  0x2f   :  { %p523_p9 = pnand %p522_p8, %p516_p5 }
  0x31   :  { %526 = shalt.err (!%p523_p9)
}
  0x32   :  { %54 = dma.hbm_to_vmem [thread:$0]  %s677_s4, 1024, %s49_s23, [#allocation7], %s557_s9, %s557_s9, %s558_s10  }
  0x33   :  { %549 = dma.done.wait [#allocation4], 128  }
  0x34   :  { %550 = vsyncadd [#allocation4], 4294967168 }
  0x35   :  { %551 = dma.done.wait [#allocation7], 2048  }
  0x36   :  { %552 = vsyncadd [#allocation7], 4294965248  ;;  %v560_v0 = vmov 0.0   ;;  %vm561_vm0 = vmmov 0   ;;  %v444_v1 = vld [vmem:[#allocation6] sm:$0xff]   ;;  %v445_v2 = vld [vmem:[#allocation6 + $0x8] sm:$0xff]   ;;  %v191_v18 = vlaneseq  ;;  %v204_v27 = vstv %s673_s0 }
  0x37   :  { %394 = vmatprep.subr.bf16.mxu0 %v560_v0  ;;  %410 = vmatprep.mubr.msk.bf16.mxu0 %vm561_vm0, %v560_v0  ;;  %v446_v3 = vld [vmem:[#allocation6 + $0x10] sm:$0xff]   ;;  %v453_v4 = vld [vmem:[#allocation8] sm:$0xff]   ;;  %v447_v5 = vld [vmem:[#allocation6 + $0x18] sm:$0xff]  }
  0x38   :  { %414 = vmatprep.subr.bf16.mxu1 %v560_v0  ;;  %430 = vmatprep.mubr.msk.bf16.mxu1 %vm561_vm0, %v560_v0  ;;  %v454_v6 = vld [vmem:[#allocation8 + $0x8] sm:$0xff]   ;;  %v448_v7 = vld [vmem:[#allocation6 + $0x20] sm:$0xff]   ;;  %v455_v8 = vld [vmem:[#allocation8 + $0x10] sm:$0xff]   ;;  %v192_v19 = vshrl.u32 %v191_v18, 7  ;;  %v198_v21 = vand.u32 127, %v191_v18 }
  0x39   :  { %395 = vmatpush3.bf16.msra.mxu0 %v444_v1  ;;  %415 = vmatpush3.bf16.msra.mxu1 %v453_v4  ;;  %v449_v9 = vld [vmem:[#allocation6 + $0x28] sm:$0xff]   ;;  %v456_v10 = vld [vmem:[#allocation8 + $0x18] sm:$0xff]   ;;  %v450_v11 = vld [vmem:[#allocation6 + $0x30] sm:$0xff]  }
  0x3a   :  { %396 = vmatprep.subr.bf16.mxu0 %v560_v0  ;;  %416 = vmatprep.subr.bf16.mxu1 %v560_v0  ;;  %v457_v12 = vld [vmem:[#allocation8 + $0x20] sm:$0xff]   ;;  %v451_v13 = vld [vmem:[#allocation6 + $0x38] sm:$0xff]   ;;  %v458_v14 = vld [vmem:[#allocation8 + $0x28] sm:$0xff]   ;;  %v193_v20 = vadd.s32 8, %v192_v19  ;;  %v199_v22 = vmul.u32 2654435761, %v192_v19 }
  0x3b   :  { %v452_v15 = vld [vmem:[#allocation3] sm:$0xff]   ;;  %v459_v16 = vld [vmem:[#allocation8 + $0x30] sm:$0xff]   ;;  %v201_v24 = vmul.u32 2246822519, %v198_v21 }
  0x3c   :  { %v460_v17 = vld [vmem:[#allocation8 + $0x38] sm:$0xff]   ;;  %v200_v23 = vmul.u32 2654435761, %v193_v20 }
  0x3d   :  { %397 = vmatpush3.bf16.msra.mxu0 %v445_v2  ;;  %417 = vmatpush3.bf16.msra.mxu1 %v454_v6  ;;  %v202_v25 = vadd.s32 %v201_v24, %v199_v22  ;;  %v354_v38 = vld [vmem:[%s676_s3] ss:$0 sm:$0xff]  ;;  %s562_s3 = smov [#allocation9]  }
  0x3e   :  { %398 = vmatprep.subr.bf16.mxu0 %v560_v0  ;;  %418 = vmatprep.subr.bf16.mxu1 %v560_v0  ;;  %v203_v26 = vadd.s32 %v201_v24, %v200_v23  ;;  %v364_v50 = vld [vmem:[%s678_s5] ss:$0 sm:$0xff]  ;;  %s341_s13 = sshll.u32 %s562_s3, 4  ;;  %s342_s13 = int_to_ptr.vmem [resolvable:$true] %s341_s13 }
  0x3f   :  { %v205_v28 = vadd.s32 %v204_v27, %v202_v25  ;;  %s527_s14 = scalar_lea.vmem %s342_s13, 256  ;;  %p532_p11 = scmp.lt.s32.totalorder %s342_s13, %s342_s13 }
  0x40   :  { %v206_v29 = vadd.s32 %v204_v27, %v203_v26  ;;  %p528_p10 = scmp.ne.s32.totalorder %s342_s13, %s527_s14  ;;  %p533_p12 = scmp.lt.s32.totalorder %s527_s14, %s527_s14 }
  0x41   :  { %399 = vmatpush3.bf16.msra.mxu0 %v446_v3  ;;  %419 = vmatpush3.bf16.msra.mxu1 %v455_v8  ;;  %v207_v30 = vshrl.u32 %v205_v28, 15 }
  0x42   :  { %400 = vmatprep.subr.bf16.mxu0 %v560_v0  ;;  %420 = vmatprep.subr.bf16.mxu1 %v560_v0  ;;  %v208_v31 = vshrl.u32 %v206_v29, 15  ;;  %p534_p13 = por %p533_p12, %p532_p11 }
  0x43   :  { %v209_v32 = vxor.u32 %v207_v30, %v205_v28 }
  0x44   :  { %v210_v33 = vxor.u32 %v208_v31, %v206_v29  ;;  %p535_p0 = pnand %p534_p13, %p528_p10 }
  0x45   :  { %401 = vmatpush3.bf16.msra.mxu0 %v447_v5  ;;  %421 = vmatpush3.bf16.msra.mxu1 %v456_v10  ;;  %v211_v34 = vmul.u32 739982445, %v209_v32 }
  0x46   :  { %402 = vmatprep.subr.bf16.mxu0 %v560_v0  ;;  %422 = vmatprep.subr.bf16.mxu1 %v560_v0  ;;  %v212_v35 = vmul.u32 739982445, %v210_v33 }
  0x47   :  { %v213_v36 = vshrl.u32 %v211_v34, 17 }
  0x48   :  { %v214_v37 = vshrl.u32 %v212_v35, 17 }
  0x49   :  { %403 = vmatpush3.bf16.msra.mxu0 %v448_v7  ;;  %423 = vmatpush3.bf16.msra.mxu1 %v457_v12  ;;  %v215_v39 = vxor.u32 %v213_v36, %v211_v34 }
  0x4a   :  { %404 = vmatprep.subr.bf16.mxu0 %v560_v0  ;;  %424 = vmatprep.subr.bf16.mxu1 %v560_v0  ;;  %v216_v40 = vxor.u32 %v214_v37, %v212_v35 }
  0x4b   :  { %vm217_vm1 = vcmp.ge.u32.totalorder %v215_v39, 2147483648 }
  0x4c   :  { %vm218_vm2 = vcmp.ge.u32.totalorder %v216_v40, 2147483648 }
  0x4d   :  { %405 = vmatpush3.bf16.msra.mxu0 %v449_v9  ;;  %425 = vmatpush3.bf16.msra.mxu1 %v458_v14  ;;  %vm373_vm3 = vmpackc.low %vm218_vm2, %vm217_vm1 }
  0x4e   :  { %406 = vmatprep.subr.bf16.mxu0 %v560_v0  ;;  %426 = vmatprep.subr.bf16.mxu1 %v560_v0 }
  0x51   :  { %407 = vmatpush3.bf16.msra.mxu0 %v450_v11  ;;  %427 = vmatpush3.bf16.msra.mxu1 %v459_v16 }
  0x52   :  { %408 = vmatprep.subr.bf16.mxu0 %v560_v0  ;;  %428 = vmatprep.subr.bf16.mxu1 %v560_v0 }
  0x55   :  { %409 = vmatpush3.bf16.msra.mxu0 %v451_v13  ;;  %429 = vmatpush3.bf16.msra.mxu1 %v460_v17 }
  0x58   :  { %411 = vmatmul.mubr.bf16.vlgmr.msra.gmra.mrb[0].mxu0 %v452_v15 }
 0x12b   :  { %v180_v41 = vpop.f32.mrb[0].mxu0 }
 0x12c   :  { %v181_v42 = vadd.f32 %v354_v38, %v180_v41  ;;  %v412_v43 = vpop.f32.mrb[1].mxu0 }
 0x12d   :  { %v183_v44 = vpop.f32.mrb[2].mxu0 }
 0x12e   :  { %v184_v45 = vadd.f32 %v354_v38, %v183_v44  ;;  %v413_v46 = vpop.f32.mrb[3].mxu0  ;;  %v187_v47 = vmax.f32 %v181_v42, 0.0 }
 0x130   :  { %v188_v48 = vmax.f32 %v184_v45, 0.0 }
 0x132   :  { %v374_v49 = vpack.c.bf16 %v188_v48, %v187_v47 }
 0x134   :  { %431 = vmatmul.mubr.msk.bf16.vlgmr.msra.gmra.mrb[0].mxu1 %vm373_vm3, %v374_v49 }
 0x207   :  { %v327_v51 = vpop.f32.mrb[0].mxu1 }
 0x208   :  { %v328_v52 = vadd.f32 %v364_v50, %v327_v51  ;;  %v432_v53 = vpop.f32.mrb[1].mxu1 }
 0x209   :  { %v330_v54 = vpop.f32.mrb[2].mxu1 }
 0x20a   :  { %334 = vst [vmem:[#allocation9] sm:$0xff] %v328_v52  ;;  %v331_v55 = vadd.f32 %v364_v50, %v330_v54  ;;  %v433_v56 = vpop.f32.mrb[3].mxu1 }
 0x20c   :  { %335 = vst [vmem:[#allocation9 + $0x8] sm:$0xff] %v331_v55 }
 0x20d   :  { %538 = shalt.err (!%p535_p0)
}
 0x20e   :  { %s539_s16 = scalar_lea.hbm %s679_s6, 256 }
 0x20f   :  { %p540_p1 = scmp.ne.s32.totalorder %s679_s6, %s539_s16  ;;  %p543_p2 = scmp.lt.u32.totalorder %s539_s16, %s679_s6 }
 0x211   :  { %p545_p3 = pnand %p543_p2, %p540_p1 }
 0x213   :  { %548 = shalt.err (!%p545_p3)
}
 0x214   :  { %s563_s2 = smov 128   ;;  %s564_s21 = smov 8  }
 0x215   :  { %347 = dma.vmem_to_hbm [thread:$0]  %s342_s13, 256, %s679_s6, [#allocation5], %s563_s2, %s563_s2, %s564_s21  }
 0x216   :  { %553 = dma.done.wait [#allocation5], 256  }
 0x217   :  { %554 = vsyncadd [#allocation5], 4294967040 }
 0x218   :  { %351 = vsyncpa [#allocation4], 1 }
 0x219   :  { %352 = vsyncpa [#allocation7], 1 }
 0x21a   :  { %353 = vsyncpa [#allocation5], 1 }

</bundles_post_ra>
